<compile_context>
chip_gen: v5e
topology: v5e:2x2
jax: 0.10.0
libtpu: 0.0.40
codegen_flags: <defaults>
</compile_context>

<pallas_src>
import jax
import jax.numpy as jnp
from jax.experimental import pallas as pl
from jax.experimental.pallas import tpu as pltpu

_LANE = 128
_TARGET_BLOCK_BYTES = 2 * 1024 * 1024  # ~2 MiB per block


def _identity_kernel(x_ref, o_ref):
    # Pure copy: the only work is DMA in / DMA out; VPU stays idle.
    o_ref[...] = x_ref[...]


@jax.jit
def identity_pallas(x):
    """Identity forward: y = x (same shape, same dtype)."""
    orig_shape = x.shape
    n = x.size
    if n == 0:
        return x  # nothing to copy; avoid a zero-sized grid

    itemsize = jnp.dtype(x.dtype).itemsize
    # Native sublane packing: f32 -> 8, bf16/f16 -> 16, int8/fp8 -> 32.
    sub = max(8, 32 // itemsize)

    # Widest lane-dense column count that divides the element count, so no
    # padding is needed (always true for typical NCHW conv shapes).  Since
    # cols equals the full 2D width, every block is a contiguous HBM chunk.
    cols = None
    for cand in (8192, 4096, 2048, 1024, 512, 256, _LANE):
        if n % cand == 0:
            cols = cand
            break

    if cols is not None:
        pad = 0
        rows = n // cols
        x2d = x.reshape(rows, cols)  # metadata-only under jit
    else:
        cols = _LANE
        rows = pl.cdiv(n, cols)
        pad = rows * cols - n
        x2d = jnp.pad(x.reshape(-1), (0, pad)).reshape(rows, cols)

    # Largest sublane-aligned row tile keeping the block <= ~2 MiB; the cdiv
    # grid masks any ragged tail block (no tile-shrinking fallback).
    max_tile_rows = max(sub, (_TARGET_BLOCK_BYTES // (cols * itemsize)) // sub * sub)
    tile_rows = rows if rows <= max_tile_rows else max_tile_rows
    grid = (pl.cdiv(rows, tile_rows),)

    out2d = pl.pallas_call(
        _identity_kernel,
        out_shape=jax.ShapeDtypeStruct((rows, cols), x.dtype),
        grid=grid,
        in_specs=[pl.BlockSpec((tile_rows, cols), lambda i: (i, 0))],
        out_specs=pl.BlockSpec((tile_rows, cols), lambda i: (i, 0)),
        # Alias only when the kernel input is a fresh (padded) intermediate.
        input_output_aliases=({0: 0} if pad > 0 else {}),
        compiler_params=pltpu.CompilerParams(
            dimension_semantics=("parallel",),   # shard row tiles across TCs
            vmem_limit_bytes=32 * 1024 * 1024,   # explicit headroom, all gens
        ),
    )(x2d)

    if pad > 0:
        return out2d.reshape(-1)[:n].reshape(orig_shape)
    return out2d.reshape(orig_shape)


if __name__ == "__main__":
    key = jax.random.PRNGKey(0)
    # NCHW input consistent with a conv-style representation module.
    x = jax.random.normal(key, (2, 4, 16, 16), dtype=jnp.float32)

    y = identity_pallas(x)
    jax.block_until_ready(y)

    assert y.shape == x.shape and y.dtype == x.dtype
    assert bool(jnp.all(y == x))
    print("KERNEL_OK")
</pallas_src>

<mosaic_0001>
module attributes {stable_mosaic.version = 11 : i64} {
  func.func @_identity_kernel(%arg0: i32, %arg1: memref<1x2048xf32, #tpu.memory_space<vmem>>, %arg2: memref<1x2048xf32, #tpu.memory_space<vmem>>) attributes {dimension_semantics = [#tpu.dimension_semantics<parallel>], iteration_bounds = array<i64: 1>, scalar_prefetch = 0 : i64, scratch_operands = 0 : i64, tpu.core_type = #tpu.core_type<tc>, window_params = [{transform_indices = @transform_0, window_bounds = array<i64: 1, 2048>}, {transform_indices = @transform_1, window_bounds = array<i64: 1, 2048>}]} {
    %c0 = arith.constant 0 : index
    %c0_0 = arith.constant 0 : index
    %0 = vector.load %arg1[%c0, %c0_0] : memref<1x2048xf32, #tpu.memory_space<vmem>>, vector<1x2048xf32>
    %c0_1 = arith.constant 0 : index
    %c0_2 = arith.constant 0 : index
    %1 = vector.load %arg2[%c0_1, %c0_2] : memref<1x2048xf32, #tpu.memory_space<vmem>>, vector<1x2048xf32>
    tpu.vector_store %arg2[%c0_1, %c0_2], %0 {strides = array<i32>} : memref<1x2048xf32, #tpu.memory_space<vmem>>, vector<1x2048xf32>,
    return
  }
  func.func @transform_0(%arg0: i32) -> (i32, i32) {
    %c0_i32 = arith.constant 0 : i32
    %c0_i32_0 = arith.constant 0 : i32
    return %arg0, %c0_i32 : i32, i32
  }
  func.func @transform_1(%arg0: i32) -> (i32, i32) {
    %c0_i32 = arith.constant 0 : i32
    %c0_i32_0 = arith.constant 0 : i32
    return %arg0, %c0_i32 : i32, i32
  }
}

</mosaic_0001>

<bundles_post_ra>
// kernel: identity_pallas.1
= control target key start
LH: loop header
LB: loop body
LE: loop exit
PB: predicated region body
PF: predicated region fallthrough
CT: control target
= control target key end

     0   :  { %s38_s0 = inlined_call_operand.vmem [shape: f32[1,2048], index: 0, kind: input, shape index: {}]   ;;  %s39_s1 = inlined_call_operand.vmem [shape: f32[1,2048], index: 1, kind: output, shape index: {}]  }
   0x1   :  { %v8_v0 = vld [vmem:[%s38_s0] sm:$0xff]  ;;  %v9_v1 = vld [vmem:[%s38_s0 + $0x8] sm:$0xff] }
   0x2   :  { %10 = vst [vmem:[%s39_s1] sm:$0xff] %v8_v0 }
   0x3   :  { %11 = vst [vmem:[%s39_s1 + $0x8] sm:$0xff] %v9_v1 }

</bundles_post_ra>
